<compile_context>
chip_gen: v7x
topology: tpu7x:2x2x1
jax: 0.10.0
libtpu: 0.0.40
codegen_flags: <defaults>
</compile_context>

<pallas_src>
import functools

import jax
import jax.numpy as jnp
from jax.experimental import pallas as pl
from jax.experimental.pallas import tpu as pltpu


def _round_up(v, m):
    return -(-v // m) * m


def _rot_matmul_kernel(x_ref, r_ref, o_ref, acc_ref):
    """out = x @ R (no bias column)."""
    k = pl.program_id(2)

    @pl.when(k == 0)
    def _():
        acc_ref[...] = jnp.zeros_like(acc_ref)

    acc_ref[...] += jnp.dot(
        x_ref[...], r_ref[...], preferred_element_type=jnp.float32
    )

    @pl.when(k == pl.num_programs(2) - 1)
    def _():
        o_ref[...] = acc_ref[...].astype(o_ref.dtype)


def _rot_matmul_bias_kernel(bias, x_ref, r_ref, rb_ref, o_ref, acc_ref):
    """out = x @ R[:D] + bias * R[D]  (rank-1 epilogue replaces the concat)."""
    k = pl.program_id(2)

    @pl.when(k == 0)
    def _():
        acc_ref[...] = jnp.zeros_like(acc_ref)

    acc_ref[...] += jnp.dot(
        x_ref[...], r_ref[...], preferred_element_type=jnp.float32
    )

    @pl.when(k == pl.num_programs(2) - 1)
    def _():
        # rb_ref is (1, tn): broadcast over rows; cheap VPU add under the MXU.
        o_ref[...] = (
            acc_ref[...] + bias * rb_ref[...].astype(jnp.float32)
        ).astype(o_ref.dtype)


@functools.partial(jax.jit, static_argnames=("bias",))
def linear_layer_rotation(x, rotation_matrix, bias=0.0):
    """Pallas implementation of LinearLayerRotation.forward.

    Args:
      x: (N, D) input.
      rotation_matrix: (D, O) if bias == 0, else (D + 1, O).
      bias: python scalar; if nonzero, equivalent to appending a constant
        column of `bias` to x before the matmul.
    """
    n, d = x.shape
    d_r, o = rotation_matrix.shape
    has_bias = bias != 0

    if has_bias:
        assert d_r == d + 1, f"rotation rows {d_r} != in_features+1 ({d + 1})"
        r_main = rotation_matrix[:d, :]
        r_bias = rotation_matrix[d:, :]          # (1, O) — rank-1 epilogue row
    else:
        assert d_r == d, f"rotation rows {d_r} != in_features ({d})"
        r_main = rotation_matrix
        r_bias = None

    # ---- Tile sizes: (8,128)-aligned, VMEM-budgeted (<~4 MiB with 2x buffering,
    # safe on v7x's 64 MiB VMEM as well as v5e/v6e). -------------------------
    tm = min(256, _round_up(n, 8))
    tn = min(512, _round_up(o, 128))
    tk = min(512, _round_up(d, 128))

    m_p = _round_up(n, tm)
    k_p = _round_up(d, tk)
    o_p = _round_up(o, tn)

    # Zero-padding K/O is mathematically a no-op for the matmul; padded M rows
    # and O columns are sliced off after the kernel. Keeps blocks lane-dense.
    x_p = x if (m_p == n and k_p == d) else jnp.pad(
        x, ((0, m_p - n), (0, k_p - d)))
    r_p = r_main if (k_p == d and o_p == o) else jnp.pad(
        r_main, ((0, k_p - d), (0, o_p - o)))

    grid = (m_p // tm, o_p // tn, k_p // tk)   # K last (reduction axis)

    x_spec = pl.BlockSpec((tm, tk), lambda i, j, k: (i, k))
    r_spec = pl.BlockSpec((tk, tn), lambda i, j, k: (k, j))
    o_spec = pl.BlockSpec((tm, tn), lambda i, j, k: (i, j))
    scratch = [pltpu.VMEM((tm, tn), jnp.float32)]
    out_shape = jax.ShapeDtypeStruct((m_p, o_p), x.dtype)

    cost = pl.CostEstimate(
        flops=2 * m_p * k_p * o_p,
        transcendentals=0,
        bytes_accessed=4 * (m_p * k_p + k_p * o_p + m_p * o_p),
    )
    cparams = pltpu.CompilerParams(
        dimension_semantics=("parallel", "parallel", "arbitrary"),
    )

    if has_bias:
        rb_p = r_bias if o_p == o else jnp.pad(r_bias, ((0, 0), (0, o_p - o)))
        rb_spec = pl.BlockSpec((1, tn), lambda i, j, k: (0, j))
        out_p = pl.pallas_call(
            functools.partial(_rot_matmul_bias_kernel, float(bias)),
            out_shape=out_shape,
            grid=grid,
            in_specs=[x_spec, r_spec, rb_spec],
            out_specs=o_spec,
            scratch_shapes=scratch,
            compiler_params=cparams,
            cost_estimate=cost,
        )(x_p, r_p, rb_p)
    else:
        out_p = pl.pallas_call(
            _rot_matmul_kernel,
            out_shape=out_shape,
            grid=grid,
            in_specs=[x_spec, r_spec],
            out_specs=o_spec,
            scratch_shapes=scratch,
            compiler_params=cparams,
            cost_estimate=cost,
        )(x_p, r_p)

    return out_p[:n, :o]


def _reference(x, rotation_matrix, bias):
    # Exact PyTorch-forward semantics, computed at highest precision.
    if bias != 0:
        x = jnp.concatenate(
            [x, jnp.full((x.shape[0], 1), bias, dtype=x.dtype)], axis=1)
    return jnp.dot(x, rotation_matrix, precision=jax.lax.Precision.HIGHEST)


def _check(out, ref):
    # Loose-ish tolerance: the MXU's default precision for f32 inputs may use
    # bf16 passes; structural bugs would produce O(1) errors, so this is safe.
    assert out.shape == ref.shape
    assert jnp.allclose(out, ref, atol=5e-2, rtol=2e-2), (
        float(jnp.max(jnp.abs(out - ref))))


if __name__ == "__main__":
    key = jax.random.PRNGKey(0)
    k_x, k_r, k_x2, k_r2 = jax.random.split(key, 4)

    # --- Case 1: small shapes consistent with the module, nonzero bias. -----
    batch, in_features, out_features = 8, 32, 16
    bias = 0.5
    x = jax.random.normal(k_x, (batch, in_features), dtype=jnp.float32)
    rotation_matrix = jax.random.normal(
        k_r, (in_features + 1, out_features), dtype=jnp.float32)

    out = jax.block_until_ready(
        linear_layer_rotation(x, rotation_matrix, bias=bias))
    _check(out, _reference(x, rotation_matrix, bias))

    # --- Case 2: bias == 0 path (no bias row, no epilogue). -----------------
    rot0 = rotation_matrix[:in_features, :]
    out0 = jax.block_until_ready(linear_layer_rotation(x, rot0, bias=0.0))
    _check(out0, _reference(x, rot0, 0.0))

    # --- Case 3: larger shapes that exercise the tiled grid (2 M-tiles,
    #     2 K-steps through the f32 accumulator) and the bias epilogue. ------
    n2, d2, o2 = 512, 1024, 256
    bias2 = 1.25
    x2 = jax.random.normal(k_x2, (n2, d2), dtype=jnp.float32)
    rot2 = jax.random.normal(k_r2, (d2 + 1, o2), dtype=jnp.float32)

    out2 = jax.block_until_ready(
        linear_layer_rotation(x2, rot2, bias=bias2))
    _check(out2, _reference(x2, rot2, bias2))

    print("KERNEL_OK")
</pallas_src>

<mosaic_0001>
module attributes {stable_mosaic.version = 11 : i64} {
  func.func @_rot_matmul_bias_kernel(%arg0: i32, %arg1: i32, %arg2: i32, %arg3: memref<8x128xf32, #tpu.memory_space<vmem>>, %arg4: memref<128x128xf32, #tpu.memory_space<vmem>>, %arg5: memref<1x128xf32, #tpu.memory_space<vmem>>, %arg6: memref<8x128xf32, #tpu.memory_space<vmem>>, %arg7: memref<8x128xf32, #tpu.memory_space<vmem>>) attributes {dimension_semantics = [#tpu.dimension_semantics<parallel>, #tpu.dimension_semantics<parallel>, #tpu.dimension_semantics<arbitrary>], iteration_bounds = array<i64: 1, 1, 1>, scalar_prefetch = 0 : i64, scratch_operands = 1 : i64, tpu.core_type = #tpu.core_type<tc>, window_params = [{transform_indices = @transform_0, window_bounds = array<i64: 8, 128>}, {transform_indices = @transform_1, window_bounds = array<i64: 128, 128>}, {transform_indices = @transform_2, window_bounds = array<i64: 1, 128>}, {transform_indices = @transform_3, window_bounds = array<i64: 8, 128>}]} {
    %c0_i32 = arith.constant 0 : i32
    %0 = arith.cmpi eq, %arg2, %c0_i32 : i32
    %1 = arith.extui %0 : i1 to i32
    %c0_i32_0 = arith.constant 0 : i32
    %2 = arith.cmpi ne, %1, %c0_i32_0 : i32
    scf.if %2 {
      %cst_10 = arith.constant 0.000000e+00 : f32
      %12 = vector.broadcast %cst_10 : f32 to vector<8x128xf32>
      %c0_11 = arith.constant 0 : index
      %c0_12 = arith.constant 0 : index
      %13 = vector.load %arg7[%c0_11, %c0_12] : memref<8x128xf32, #tpu.memory_space<vmem>>, vector<8x128xf32>
      tpu.vector_store %arg7[%c0_11, %c0_12], %12 {strides = array<i32>} : memref<8x128xf32, #tpu.memory_space<vmem>>, vector<8x128xf32>,
    } else {
    }
    %c0 = arith.constant 0 : index
    %c0_1 = arith.constant 0 : index
    %3 = vector.load %arg7[%c0, %c0_1] : memref<8x128xf32, #tpu.memory_space<vmem>>, vector<8x128xf32>
    %c0_2 = arith.constant 0 : index
    %c0_3 = arith.constant 0 : index
    %4 = vector.load %arg3[%c0_2, %c0_3] : memref<8x128xf32, #tpu.memory_space<vmem>>, vector<8x128xf32>
    %c0_4 = arith.constant 0 : index
    %c0_5 = arith.constant 0 : index
    %5 = vector.load %arg4[%c0_4, %c0_5] : memref<128x128xf32, #tpu.memory_space<vmem>>, vector<128x128xf32>
    %cst = arith.constant dense<0.000000e+00> : vector<8x128xf32>
    %6 = tpu.matmul %4, %5, %cst {dimension_numbers = #tpu.dot_dimension_numbers<[1], [0], [0], [1], [0, 0, 1, 1], [], []>} : vector<8x128xf32>, vector<128x128xf32>, vector<8x128xf32> -> vector<8x128xf32>
    %7 = arith.addf %3, %6 : vector<8x128xf32>
    %c0_6 = arith.constant 0 : index
    %c0_7 = arith.constant 0 : index
    %8 = vector.load %arg7[%c0_6, %c0_7] : memref<8x128xf32, #tpu.memory_space<vmem>>, vector<8x128xf32>
    tpu.vector_store %arg7[%c0_6, %c0_7], %7 {strides = array<i32>} : memref<8x128xf32, #tpu.memory_space<vmem>>, vector<8x128xf32>,
    %c0_i32_8 = arith.constant 0 : i32
    %9 = arith.cmpi eq, %arg2, %c0_i32_8 : i32
    %10 = arith.extui %9 : i1 to i32
    %c0_i32_9 = arith.constant 0 : i32
    %11 = arith.cmpi ne, %10, %c0_i32_9 : i32
    scf.if %11 {
      %c0_10 = arith.constant 0 : index
      %c0_11 = arith.constant 0 : index
      %12 = vector.load %arg7[%c0_10, %c0_11] : memref<8x128xf32, #tpu.memory_space<vmem>>, vector<8x128xf32>
      %c0_12 = arith.constant 0 : index
      %c0_13 = arith.constant 0 : index
      %13 = vector.load %arg5[%c0_12, %c0_13] : memref<1x128xf32, #tpu.memory_space<vmem>>, vector<1x128xf32>
      %cst_14 = arith.constant 5.000000e-01 : f32
      %14 = vector.broadcast %cst_14 : f32 to vector<1x128xf32>
      %15 = arith.mulf %14, %13 : vector<1x128xf32>
      %16 = vector.broadcast %15 : vector<1x128xf32> to vector<8x128xf32>
      %17 = arith.addf %12, %16 : vector<8x128xf32>
      %c0_15 = arith.constant 0 : index
      %c0_16 = arith.constant 0 : index
      %18 = vector.load %arg6[%c0_15, %c0_16] : memref<8x128xf32, #tpu.memory_space<vmem>>, vector<8x128xf32>
      tpu.vector_store %arg6[%c0_15, %c0_16], %17 {strides = array<i32>} : memref<8x128xf32, #tpu.memory_space<vmem>>, vector<8x128xf32>,
    } else {
    }
    return
  }
  func.func @transform_0(%arg0: i32, %arg1: i32, %arg2: i32) -> (i32, i32) {
    %c0_i32 = arith.constant 0 : i32
    return %arg0, %arg2 : i32, i32
  }
  func.func @transform_1(%arg0: i32, %arg1: i32, %arg2: i32) -> (i32, i32) {
    %c0_i32 = arith.constant 0 : i32
    return %arg2, %arg1 : i32, i32
  }
  func.func @transform_2(%arg0: i32, %arg1: i32, %arg2: i32) -> (i32, i32) {
    %c0_i32 = arith.constant 0 : i32
    %c0_i32_0 = arith.constant 0 : i32
    return %c0_i32, %arg1 : i32, i32
  }
  func.func @transform_3(%arg0: i32, %arg1: i32, %arg2: i32) -> (i32, i32) {
    %c0_i32 = arith.constant 0 : i32
    return %arg0, %arg1 : i32, i32
  }
}

</mosaic_0001>

<bundles_post_ra>
// kernel: linear_layer_rotation.1
= control target key start
LH: loop header
LB: loop body
LE: loop exit
PB: predicated region body
PF: predicated region fallthrough
CT: control target
= control target key end

     0   :  { %v242_v3 = vmov 0.0|0.0   ;;  %vm243_vm0 = vmmov 0   ;;  %v244_v6 = vmov 0.0   ;;  %s332_s0 = inlined_call_operand.vmem [shape: f32[8,128], index: 0, kind: input, shape index: {}]   ;;  %s333_s1 = inlined_call_operand.vmem [shape: f32[128,128], index: 1, kind: input, shape index: {}]   ;;  %s334_s2 = inlined_call_operand.vmem [shape: f32[1,128], index: 2, kind: input, shape index: {}]   ;;  %s335_s3 = inlined_call_operand.hbm [shape: f32[8,128], index: 3, kind: output, shape index: {}]  }
   0x1   :  { %v22_v0 = vld [vmem:[%s333_s1] sm:$0xff]  ;;  %v23_v1 = vld [vmem:[%s333_s1 + $0x8] sm:$0xff]  ;;  %v24_v2 = vld [vmem:[%s333_s1 + $0x10] sm:$0xff]  ;;  %190 = vmatprep.subr.bf16.mxu0 %v242_v3  ;;  %187 = vmatprep.mubr.msk.f32.mxu0 %vm243_vm0, %v244_v6 }
   0x2   :  { %v191_v4 = vpack.c.bf16 %v23_v1, %v22_v0  ;;  %v25_v5 = vld [vmem:[%s333_s1 + $0x18] sm:$0xff]  ;;  %v26_v8 = vld [vmem:[%s333_s1 + $0x20] sm:$0xff]  ;;  %v27_v9 = vld [vmem:[%s333_s1 + $0x28] sm:$0xff] }
   0x3   :  { %v194_v7 = vpack.c.bf16 %v25_v5, %v24_v2 }
   0x4   :  { %192 = vmatpush3.bf16.msra.mxu0 %v191_v4 }
   0x5   :  { %193 = vmatprep.subr.bf16.mxu0 %v242_v3 }
   0x6   :  { %8 = vsyncpa [#allocation4], 0  ;;  %v197_v10 = vpack.c.bf16 %v27_v9, %v26_v8  ;;  %v28_v11 = vld [vmem:[%s333_s1 + $0x30] sm:$0xff]  ;;  %v29_v12 = vld [vmem:[%s333_s1 + $0x38] sm:$0xff]  ;;  %v117_v27 = vlaneseq  ;;  %s245_s21 = smov [#allocation3]  }
   0x7   :  { %v200_v13 = vpack.c.bf16 %v29_v12, %v28_v11  ;;  %v30_v14 = vld [vmem:[%s333_s1 + $0x40] sm:$0xff]  ;;  %v31_v15 = vld [vmem:[%s333_s1 + $0x48] sm:$0xff]  ;;  %v32_v17 = vld [vmem:[%s333_s1 + $0x50] sm:$0xff] }
   0x8   :  { %195 = vmatpush3.bf16.msra.mxu0 %v194_v7  ;;  %v203_v16 = vpack.c.bf16 %v31_v15, %v30_v14  ;;  %v33_v18 = vld [vmem:[%s333_s1 + $0x58] sm:$0xff]  ;;  %v34_v20 = vld [vmem:[%s333_s1 + $0x60] sm:$0xff]  ;;  %v35_v21 = vld [vmem:[%s333_s1 + $0x68] sm:$0xff]  ;;  %v118_v28 = vshrl.u32 %v117_v27, 7 }
   0x9   :  { %196 = vmatprep.subr.bf16.mxu0 %v242_v3  ;;  %v206_v19 = vpack.c.bf16 %v33_v18, %v32_v17  ;;  %v209_v22 = vpack.c.bf16 %v35_v21, %v34_v20  ;;  %v36_v23 = vld [vmem:[%s333_s1 + $0x70] sm:$0xff]  ;;  %v37_v24 = vld [vmem:[%s333_s1 + $0x78] sm:$0xff]  ;;  %v21_v26 = vld [vmem:[%s332_s0] sm:$0xff]  ;;  %s130_s1 = sshll.u32 %s245_s21, 4  ;;  %s131_s1 = int_to_ptr.vmem [resolvable:$true] %s130_s1 }
   0xa   :  { %v212_v25 = vpack.c.bf16 %v37_v24, %v36_v23  ;;  %v114_v29 = vld [vmem:[%s334_s2] sm:$0x1]  ;;  %v119_v31 = vsub.s32 0, %v118_v28  ;;  %s218_s22 = scalar_lea.vmem %s131_s1, 128  ;;  %p223_p1 = scmp.lt.s32.totalorder %s131_s1, %s131_s1 }
   0xb   :  { %v115_v30 = vmul.f32 0.5, %v114_v29  ;;  %p219_p0 = scmp.ne.s32.totalorder %s131_s1, %s218_s22  ;;  %p224_p2 = scmp.lt.s32.totalorder %s218_s22, %s218_s22 }
   0xc   :  { %198 = vmatpush3.bf16.msra.mxu0 %v197_v10 }
   0xd   :  { %199 = vmatprep.subr.bf16.mxu0 %v242_v3  ;;  %v120_v32 = vrot.slane %v115_v30, %v119_v31  ;;  %p225_p3 = por %p224_p2, %p223_p1 }
   0xf   :  { %p226_p4 = pnand %p225_p3, %p219_p0 }
  0x10   :  { %201 = vmatpush3.bf16.msra.mxu0 %v200_v13 }
  0x11   :  { %202 = vmatprep.subr.bf16.mxu0 %v242_v3 }
  0x14   :  { %204 = vmatpush3.bf16.msra.mxu0 %v203_v16 }
  0x15   :  { %205 = vmatprep.subr.bf16.mxu0 %v242_v3 }
  0x18   :  { %207 = vmatpush3.bf16.msra.mxu0 %v206_v19 }
  0x19   :  { %208 = vmatprep.subr.bf16.mxu0 %v242_v3 }
  0x1c   :  { %210 = vmatpush3.bf16.msra.mxu0 %v209_v22 }
  0x1d   :  { %211 = vmatprep.subr.bf16.mxu0 %v242_v3 }
  0x20   :  { %213 = vmatpush3.bf16.msra.mxu0 %v212_v25 }
  0x23   :  { %188 = vmatmul.mubr.f32.vlgmr.msra.gmra.mrb[0].mxu0 %v21_v26 }
  0xf6   :  { %v104_v33 = vpop.f32.mrb[0].mxu0 }
  0xf7   :  { %v122_v34 = vadd.f32 %v120_v32, %v104_v33  ;;  %v189_v35 = vpop.f32.mrb[1].mxu0 }
  0xf9   :  { %123 = vst [vmem:[#allocation3] sm:$0xff] %v122_v34 }
  0xfa   :  { %229 = shalt.err (!%p226_p4)
}
  0xfb   :  { %s230_s2 = scalar_lea.hbm %s335_s3, 128 }
  0xfc   :  { %p231_p5 = scmp.ne.s32.totalorder %s335_s3, %s230_s2  ;;  %p234_p6 = scmp.lt.u32.totalorder %s230_s2, %s335_s3 }
  0xfe   :  { %p236_p7 = pnand %p234_p6, %p231_p5 }
 0x100   :  { %239 = shalt.err (!%p236_p7)
}
 0x101   :  { %133 = dma.vmem_to_hbm [thread:$0]  %s131_s1, 128, %s335_s3, [#allocation4]  }
 0x102   :  { %240 = dma.done.wait [#allocation4], 128  }
 0x103   :  { %241 = vsyncadd [#allocation4], 4294967168 }
 0x104   :  { %137 = vsyncpa [#allocation4], 1 }

</bundles_post_ra>
